<compile_context>
chip_gen: v5e
topology: v5e:2x2
jax: 0.10.0
libtpu: 0.0.40
codegen_flags: <defaults>
</compile_context>

<pallas_src>
import functools

import jax
import jax.numpy as jnp
from jax.experimental import pallas as pl
from jax.experimental.pallas import tpu as pltpu


def rgcn_layer_kernel(a_ref, x_ref, w_cat_ref, o_ref, y_ref, *, num_rels,
                      add_input_residual):
    """One grid step = one tile of destination nodes.

    a_ref     : [R, TM, N]   bf16  adjacency rows of this dst tile, all relations
    x_ref     : [N, P]       f32   all source-node features (lane-padded)
    w_cat_ref : [P, (R+1)*P] f32   [W_1 | ... | W_R | W_self] (lane-padded)
    o_ref     : [TM, P]      f32   layer output tile (optionally + X tile)
    y_ref     : [N, (R+1)*P] f32   VMEM scratch: batched projection X @ W_cat
    """
    P = x_ref.shape[1]
    TM = o_ref.shape[0]
    i = pl.program_id(0)
    row0 = pl.multiple_of(i * TM, TM)

    # Batched projection: one wide MXU matmul instead of (R+1) tiny ones.
    y_ref[...] = jnp.dot(x_ref[...], w_cat_ref[...],
                         preferred_element_type=jnp.float32)

    # Self-loop term: X[dst tile] @ W_self == last column block of Y.
    acc = y_ref[pl.ds(row0, TM), pl.ds(num_rels * P, P)]

    # Message passing: sum_r A_r[dst tile, :] @ (X @ W_r).  R is small & static,
    # so the loop is unrolled; column slices of Y are static and 128-aligned.
    for r in range(num_rels):
        a_r = a_ref[r].astype(jnp.float32)            # bf16 counts -> f32 (exact)
        acc = acc + jnp.dot(a_r, y_ref[:, pl.ds(r * P, P)],
                            preferred_element_type=jnp.float32)

    if add_input_residual:
        # Fused residual: directly emit h + x for the next layer.
        acc = acc + x_ref[pl.ds(row0, TM), :]

    o_ref[...] = acc.astype(o_ref.dtype)


def rgcn_layer(x_pad, adj_bf16, w_cat, *, add_input_residual=False, tile_m=None,
               vmem_limit_bytes=32 * 1024 * 1024):
    """x_pad: [N, P] f32, adj_bf16: [R, N, N] bf16 (A[r, dst, src]),
    w_cat: [P, (R+1)*P] f32.  Returns layer(x) (+ x if add_input_residual)."""
    N, P = x_pad.shape
    R = adj_bf16.shape[0]
    assert adj_bf16.shape == (R, N, N)
    assert w_cat.shape == (P, (R + 1) * P)
    assert P % 128 == 0

    if tile_m is None:
        # One tile at toy sizes; cap the per-tile adjacency block at larger N.
        tile_m = N if (N <= 512 or N % 256 != 0) else 256
    assert N % tile_m == 0 and (tile_m == N or tile_m % 16 == 0)
    num_tiles = N // tile_m

    kernel = functools.partial(rgcn_layer_kernel, num_rels=R,
                               add_input_residual=add_input_residual)

    return pl.pallas_call(
        kernel,
        out_shape=jax.ShapeDtypeStruct((N, P), x_pad.dtype),
        grid_spec=pltpu.PrefetchScalarGridSpec(
            num_scalar_prefetch=0,
            grid=(num_tiles,),
            in_specs=[
                # adjacency rows of this dst tile, every relation (bf16)
                pl.BlockSpec((R, tile_m, N), lambda i: (0, i, 0)),
                # all source-node features (resident)
                pl.BlockSpec((N, P), lambda i: (0, 0)),
                # [W_1 | ... | W_R | W_self] (resident)
                pl.BlockSpec((P, (R + 1) * P), lambda i: (0, 0)),
            ],
            out_specs=pl.BlockSpec((tile_m, P), lambda i: (i, 0)),
            scratch_shapes=[pltpu.VMEM((N, (R + 1) * P), jnp.float32)],
        ),
        compiler_params=pltpu.CompilerParams(
            dimension_semantics=("parallel",),   # dst tiles are independent
            vmem_limit_bytes=vmem_limit_bytes,
        ),
    )(adj_bf16, x_pad, w_cat)


@jax.jit
def rgcn_model_forward(emb, adj, w_rel, w_self):
    """emb: [N, H], adj: [R, N, N] f32 (A[r, dst, src]), w_rel: [R, H, O],
    w_self: [H, O].  Returns h2 = conv1(conv1(emb) + emb)  of shape [N, O]."""
    N, H = emb.shape
    R, _, O = w_rel.shape
    assert H == O, "conv1 is reused (hidden -> hidden)"
    P = ((max(H, O) + 127) // 128) * 128        # lane-dense feature width

    # Zero-pad features / weights to the lane-dense width (exact; changes nothing).
    x_pad = jnp.pad(emb, ((0, 0), (0, P - H)))
    w_rel_pad = jnp.zeros((R, P, P), w_rel.dtype).at[:, :H, :O].set(w_rel)
    w_self_pad = jnp.zeros((P, P), w_self.dtype).at[:H, :O].set(w_self)
    w_all = jnp.concatenate([w_rel_pad, w_self_pad[None]], axis=0)     # [R+1,P,P]
    w_cat = jnp.transpose(w_all, (1, 0, 2)).reshape(P, (R + 1) * P)    # [P,(R+1)P]

    # Small integer edge counts are exact in bf16; halves adjacency DMA bytes.
    adj_bf16 = adj.astype(jnp.bfloat16)

    # h1 = conv1(x); the kernel directly emits h1 + x (fused residual).
    h1_plus_x = rgcn_layer(x_pad, adj_bf16, w_cat, add_input_residual=True)
    # h2 = conv1(h1 + x)   (conv1 reused twice; the module's conv2 is unused).
    h2 = rgcn_layer(h1_plus_x, adj_bf16, w_cat, add_input_residual=False)
    return h2[:, :O]


def reference_forward(emb, adj, w_rel, w_self):
    """Pure-JAX reference for correctness checking."""
    def layer(x):
        msg = jnp.einsum("rvu,uh,rho->vo", adj, x, w_rel)
        return msg + x @ w_self
    h1 = layer(emb)
    return layer(h1 + emb)


if __name__ == "__main__":
    # Small synthetic graph / model sizes.
    num_nodes = 64
    hidden_dim = 32
    num_rels = 3
    # TODO(synk): module passes num_bases=0 (degenerate for 'basis' regularizer);
    # we use num_bases=2 here for a well-defined basis decomposition.
    num_bases = 2
    num_edges = 256

    key = jax.random.PRNGKey(0)
    k_emb, k_basis, k_coef, k_self, k_src, k_dst, k_et = jax.random.split(key, 7)

    # Parameters (deterministic, synthetic).
    emb = jax.random.normal(k_emb, (num_nodes, hidden_dim), jnp.float32) * 0.1
    bases = jax.random.normal(k_basis, (num_bases, hidden_dim, hidden_dim),
                              jnp.float32) * 0.1
    coeff = jax.random.normal(k_coef, (num_rels, num_bases), jnp.float32)
    w_self = jax.random.normal(k_self, (hidden_dim, hidden_dim), jnp.float32) * 0.1
    # Basis regularizer: W_r = sum_b coeff[r, b] * bases[b]   (cheap glue, plain JAX)
    w_rel = jnp.einsum("rb,bio->rio", coeff, bases)

    # Synthetic graph: random edges with random relation types -> dense per-rel adjacency.
    src = jax.random.randint(k_src, (num_edges,), 0, num_nodes)
    dst = jax.random.randint(k_dst, (num_edges,), 0, num_nodes)
    etype = jax.random.randint(k_et, (num_edges,), 0, num_rels)
    adj = jnp.zeros((num_rels, num_nodes, num_nodes), jnp.float32)
    adj = adj.at[etype, dst, src].add(1.0)  # A[r, dst, src]

    out = rgcn_model_forward(emb, adj, w_rel, w_self)
    out = jax.block_until_ready(out)

    ref = reference_forward(emb, adj, w_rel, w_self)
    assert out.shape == (num_nodes, hidden_dim)
    assert jnp.allclose(out, ref, atol=1e-4, rtol=1e-4), "mismatch vs reference"

    print("KERNEL_OK")
</pallas_src>

<mosaic_0001>
module attributes {stable_mosaic.version = 11 : i64} {
  func.func @rgcn_layer_kernel(%arg0: i32, %arg1: memref<3x64x64xbf16, #tpu.memory_space<vmem>>, %arg2: memref<64x128xf32, #tpu.memory_space<vmem>>, %arg3: memref<128x512xf32, #tpu.memory_space<vmem>>, %arg4: memref<64x128xf32, #tpu.memory_space<vmem>>, %arg5: memref<64x512xf32, #tpu.memory_space<vmem>>) attributes {dimension_semantics = [#tpu.dimension_semantics<parallel>], iteration_bounds = array<i64: 1>, scalar_prefetch = 0 : i64, scratch_operands = 1 : i64, tpu.core_type = #tpu.core_type<tc>, window_params = [{transform_indices = @transform_0, window_bounds = array<i64: 3, 64, 64>}, {pipeline_mode = #tpu.pipeline_mode<synchronous>, transform_indices = @transform_1, window_bounds = array<i64: 64, 128>}, {pipeline_mode = #tpu.pipeline_mode<synchronous>, transform_indices = @transform_2, window_bounds = array<i64: 128, 512>}, {transform_indices = @transform_3, window_bounds = array<i64: 64, 128>}]} {
    %c64_i32 = arith.constant 64 : i32
    %0 = arith.muli %arg0, %c64_i32 : i32
    %1 = tpu.assume_multiple %0, 64 : i32
    %c0 = arith.constant 0 : index
    %c0_0 = arith.constant 0 : index
    %2 = vector.load %arg2[%c0, %c0_0] : memref<64x128xf32, #tpu.memory_space<vmem>>, vector<64x128xf32>
    %c0_1 = arith.constant 0 : index
    %c0_2 = arith.constant 0 : index
    %3 = vector.load %arg3[%c0_1, %c0_2] : memref<128x512xf32, #tpu.memory_space<vmem>>, vector<128x512xf32>
    %cst = arith.constant dense<0.000000e+00> : vector<64x512xf32>
    %4 = tpu.matmul %2, %3, %cst {dimension_numbers = #tpu.dot_dimension_numbers<[1], [0], [0], [1], [0, 0, 1, 1], [], []>} : vector<64x128xf32>, vector<128x512xf32>, vector<64x512xf32> -> vector<64x512xf32>
    %c0_3 = arith.constant 0 : index
    %c0_4 = arith.constant 0 : index
    %5 = vector.load %arg5[%c0_3, %c0_4] : memref<64x512xf32, #tpu.memory_space<vmem>>, vector<64x512xf32>
    tpu.vector_store %arg5[%c0_3, %c0_4], %4 {strides = array<i32>} : memref<64x512xf32, #tpu.memory_space<vmem>>, vector<64x512xf32>,
    %6 = arith.index_cast %1 : i32 to index
    %c384 = arith.constant 384 : index
    %7 = vector.load %arg5[%6, %c384] : memref<64x512xf32, #tpu.memory_space<vmem>>, vector<64x128xf32>
    %c0_5 = arith.constant 0 : index
    %c0_6 = arith.constant 0 : index
    %c0_7 = arith.constant 0 : index
    %8 = vector.load %arg1[%c0_5, %c0_6, %c0_7] : memref<3x64x64xbf16, #tpu.memory_space<vmem>>, vector<1x64x64xbf16>
    %9 = vector.shape_cast %8 : vector<1x64x64xbf16> to vector<64x64xbf16>
    %10 = arith.extf %9 : vector<64x64xbf16> to vector<64x64xf32>
    %c0_8 = arith.constant 0 : index
    %c0_9 = arith.constant 0 : index
    %11 = vector.load %arg5[%c0_8, %c0_9] : memref<64x512xf32, #tpu.memory_space<vmem>>, vector<64x128xf32>
    %cst_10 = arith.constant dense<0.000000e+00> : vector<64x128xf32>
    %12 = tpu.matmul %10, %11, %cst_10 {dimension_numbers = #tpu.dot_dimension_numbers<[1], [0], [0], [1], [0, 0, 1, 1], [], []>} : vector<64x64xf32>, vector<64x128xf32>, vector<64x128xf32> -> vector<64x128xf32>
    %13 = arith.addf %7, %12 : vector<64x128xf32>
    %c1 = arith.constant 1 : index
    %c0_11 = arith.constant 0 : index
    %c0_12 = arith.constant 0 : index
    %14 = vector.load %arg1[%c1, %c0_11, %c0_12] : memref<3x64x64xbf16, #tpu.memory_space<vmem>>, vector<1x64x64xbf16>
    %15 = vector.shape_cast %14 : vector<1x64x64xbf16> to vector<64x64xbf16>
    %16 = arith.extf %15 : vector<64x64xbf16> to vector<64x64xf32>
    %c0_13 = arith.constant 0 : index
    %c128 = arith.constant 128 : index
    %17 = vector.load %arg5[%c0_13, %c128] : memref<64x512xf32, #tpu.memory_space<vmem>>, vector<64x128xf32>
    %cst_14 = arith.constant dense<0.000000e+00> : vector<64x128xf32>
    %18 = tpu.matmul %16, %17, %cst_14 {dimension_numbers = #tpu.dot_dimension_numbers<[1], [0], [0], [1], [0, 0, 1, 1], [], []>} : vector<64x64xf32>, vector<64x128xf32>, vector<64x128xf32> -> vector<64x128xf32>
    %19 = arith.addf %13, %18 : vector<64x128xf32>
    %c2 = arith.constant 2 : index
    %c0_15 = arith.constant 0 : index
    %c0_16 = arith.constant 0 : index
    %20 = vector.load %arg1[%c2, %c0_15, %c0_16] : memref<3x64x64xbf16, #tpu.memory_space<vmem>>, vector<1x64x64xbf16>
    %21 = vector.shape_cast %20 : vector<1x64x64xbf16> to vector<64x64xbf16>
    %22 = arith.extf %21 : vector<64x64xbf16> to vector<64x64xf32>
    %c0_17 = arith.constant 0 : index
    %c256 = arith.constant 256 : index
    %23 = vector.load %arg5[%c0_17, %c256] : memref<64x512xf32, #tpu.memory_space<vmem>>, vector<64x128xf32>
    %cst_18 = arith.constant dense<0.000000e+00> : vector<64x128xf32>
    %24 = tpu.matmul %22, %23, %cst_18 {dimension_numbers = #tpu.dot_dimension_numbers<[1], [0], [0], [1], [0, 0, 1, 1], [], []>} : vector<64x64xf32>, vector<64x128xf32>, vector<64x128xf32> -> vector<64x128xf32>
    %25 = arith.addf %19, %24 : vector<64x128xf32>
    %c0_19 = arith.constant 0 : index
    %c0_20 = arith.constant 0 : index
    %26 = vector.load %arg4[%c0_19, %c0_20] : memref<64x128xf32, #tpu.memory_space<vmem>>, vector<64x128xf32>
    tpu.vector_store %arg4[%c0_19, %c0_20], %25 {strides = array<i32>} : memref<64x128xf32, #tpu.memory_space<vmem>>, vector<64x128xf32>,
    return
  }
  func.func @transform_0(%arg0: i32) -> (i32, i32, i32) {
    %c0_i32 = arith.constant 0 : i32
    %c0_i32_0 = arith.constant 0 : i32
    %c0_i32_1 = arith.constant 0 : i32
    return %c0_i32, %arg0, %c0_i32_0 : i32, i32, i32
  }
  func.func @transform_1(%arg0: i32) -> (i32, i32) {
    %c0_i32 = arith.constant 0 : i32
    %c0_i32_0 = arith.constant 0 : i32
    %c0_i32_1 = arith.constant 0 : i32
    return %c0_i32, %c0_i32_0 : i32, i32
  }
  func.func @transform_2(%arg0: i32) -> (i32, i32) {
    %c0_i32 = arith.constant 0 : i32
    %c0_i32_0 = arith.constant 0 : i32
    %c0_i32_1 = arith.constant 0 : i32
    return %c0_i32, %c0_i32_0 : i32, i32
  }
  func.func @transform_3(%arg0: i32) -> (i32, i32) {
    %c0_i32 = arith.constant 0 : i32
    %c0_i32_0 = arith.constant 0 : i32
    return %arg0, %c0_i32 : i32, i32
  }
}

module attributes {stable_mosaic.version = 11 : i64} {
  func.func @rgcn_layer_kernel(%arg0: i32, %arg1: memref<3x64x64xbf16, #tpu.memory_space<vmem>>, %arg2: memref<64x128xf32, #tpu.memory_space<vmem>>, %arg3: memref<128x512xf32, #tpu.memory_space<vmem>>, %arg4: memref<64x128xf32, #tpu.memory_space<vmem>>, %arg5: memref<64x512xf32, #tpu.memory_space<vmem>>) attributes {dimension_semantics = [#tpu.dimension_semantics<parallel>], iteration_bounds = array<i64: 1>, scalar_prefetch = 0 : i64, scratch_operands = 1 : i64, tpu.core_type = #tpu.core_type<tc>, window_params = [{transform_indices = @transform_0, window_bounds = array<i64: 3, 64, 64>}, {pipeline_mode = #tpu.pipeline_mode<synchronous>, transform_indices = @transform_1, window_bounds = array<i64: 64, 128>}, {pipeline_mode = #tpu.pipeline_mode<synchronous>, transform_indices = @transform_2, window_bounds = array<i64: 128, 512>}, {transform_indices = @transform_3, window_bounds = array<i64: 64, 128>}]} {
    %c64_i32 = arith.constant 64 : i32
    %0 = arith.muli %arg0, %c64_i32 : i32
    %1 = tpu.assume_multiple %0, 64 : i32
    %c0 = arith.constant 0 : index
    %c0_0 = arith.constant 0 : index
    %2 = vector.load %arg2[%c0, %c0_0] : memref<64x128xf32, #tpu.memory_space<vmem>>, vector<64x128xf32>
    %c0_1 = arith.constant 0 : index
    %c0_2 = arith.constant 0 : index
    %3 = vector.load %arg3[%c0_1, %c0_2] : memref<128x512xf32, #tpu.memory_space<vmem>>, vector<128x512xf32>
    %cst = arith.constant dense<0.000000e+00> : vector<64x512xf32>
    %4 = tpu.matmul %2, %3, %cst {dimension_numbers = #tpu.dot_dimension_numbers<[1], [0], [0], [1], [0, 0, 1, 1], [], []>} : vector<64x128xf32>, vector<128x512xf32>, vector<64x512xf32> -> vector<64x512xf32>
    %c0_3 = arith.constant 0 : index
    %c0_4 = arith.constant 0 : index
    %5 = vector.load %arg5[%c0_3, %c0_4] : memref<64x512xf32, #tpu.memory_space<vmem>>, vector<64x512xf32>
    tpu.vector_store %arg5[%c0_3, %c0_4], %4 {strides = array<i32>} : memref<64x512xf32, #tpu.memory_space<vmem>>, vector<64x512xf32>,
    %6 = arith.index_cast %1 : i32 to index
    %c384 = arith.constant 384 : index
    %7 = vector.load %arg5[%6, %c384] : memref<64x512xf32, #tpu.memory_space<vmem>>, vector<64x128xf32>
    %c0_5 = arith.constant 0 : index
    %c0_6 = arith.constant 0 : index
    %c0_7 = arith.constant 0 : index
    %8 = vector.load %arg1[%c0_5, %c0_6, %c0_7] : memref<3x64x64xbf16, #tpu.memory_space<vmem>>, vector<1x64x64xbf16>
    %9 = vector.shape_cast %8 : vector<1x64x64xbf16> to vector<64x64xbf16>
    %10 = arith.extf %9 : vector<64x64xbf16> to vector<64x64xf32>
    %c0_8 = arith.constant 0 : index
    %c0_9 = arith.constant 0 : index
    %11 = vector.load %arg5[%c0_8, %c0_9] : memref<64x512xf32, #tpu.memory_space<vmem>>, vector<64x128xf32>
    %cst_10 = arith.constant dense<0.000000e+00> : vector<64x128xf32>
    %12 = tpu.matmul %10, %11, %cst_10 {dimension_numbers = #tpu.dot_dimension_numbers<[1], [0], [0], [1], [0, 0, 1, 1], [], []>} : vector<64x64xf32>, vector<64x128xf32>, vector<64x128xf32> -> vector<64x128xf32>
    %13 = arith.addf %7, %12 : vector<64x128xf32>
    %c1 = arith.constant 1 : index
    %c0_11 = arith.constant 0 : index
    %c0_12 = arith.constant 0 : index
    %14 = vector.load %arg1[%c1, %c0_11, %c0_12] : memref<3x64x64xbf16, #tpu.memory_space<vmem>>, vector<1x64x64xbf16>
    %15 = vector.shape_cast %14 : vector<1x64x64xbf16> to vector<64x64xbf16>
    %16 = arith.extf %15 : vector<64x64xbf16> to vector<64x64xf32>
    %c0_13 = arith.constant 0 : index
    %c128 = arith.constant 128 : index
    %17 = vector.load %arg5[%c0_13, %c128] : memref<64x512xf32, #tpu.memory_space<vmem>>, vector<64x128xf32>
    %cst_14 = arith.constant dense<0.000000e+00> : vector<64x128xf32>
    %18 = tpu.matmul %16, %17, %cst_14 {dimension_numbers = #tpu.dot_dimension_numbers<[1], [0], [0], [1], [0, 0, 1, 1], [], []>} : vector<64x64xf32>, vector<64x128xf32>, vector<64x128xf32> -> vector<64x128xf32>
    %19 = arith.addf %13, %18 : vector<64x128xf32>
    %c2 = arith.constant 2 : index
    %c0_15 = arith.constant 0 : index
    %c0_16 = arith.constant 0 : index
    %20 = vector.load %arg1[%c2, %c0_15, %c0_16] : memref<3x64x64xbf16, #tpu.memory_space<vmem>>, vector<1x64x64xbf16>
    %21 = vector.shape_cast %20 : vector<1x64x64xbf16> to vector<64x64xbf16>
    %22 = arith.extf %21 : vector<64x64xbf16> to vector<64x64xf32>
    %c0_17 = arith.constant 0 : index
    %c256 = arith.constant 256 : index
    %23 = vector.load %arg5[%c0_17, %c256] : memref<64x512xf32, #tpu.memory_space<vmem>>, vector<64x128xf32>
    %cst_18 = arith.constant dense<0.000000e+00> : vector<64x128xf32>
    %24 = tpu.matmul %22, %23, %cst_18 {dimension_numbers = #tpu.dot_dimension_numbers<[1], [0], [0], [1], [0, 0, 1, 1], [], []>} : vector<64x64xf32>, vector<64x128xf32>, vector<64x128xf32> -> vector<64x128xf32>
    %25 = arith.addf %19, %24 : vector<64x128xf32>
    %26 = arith.index_cast %1 : i32 to index
    %c0_19 = arith.constant 0 : index
    %27 = vector.load %arg2[%26, %c0_19] : memref<64x128xf32, #tpu.memory_space<vmem>>, vector<64x128xf32>
    %28 = arith.addf %25, %27 : vector<64x128xf32>
    %c0_20 = arith.constant 0 : index
    %c0_21 = arith.constant 0 : index
    %29 = vector.load %arg4[%c0_20, %c0_21] : memref<64x128xf32, #tpu.memory_space<vmem>>, vector<64x128xf32>
    tpu.vector_store %arg4[%c0_20, %c0_21], %28 {strides = array<i32>} : memref<64x128xf32, #tpu.memory_space<vmem>>, vector<64x128xf32>,
    return
  }
  func.func @transform_0(%arg0: i32) -> (i32, i32, i32) {
    %c0_i32 = arith.constant 0 : i32
    %c0_i32_0 = arith.constant 0 : i32
    %c0_i32_1 = arith.constant 0 : i32
    return %c0_i32, %arg0, %c0_i32_0 : i32, i32, i32
  }
  func.func @transform_1(%arg0: i32) -> (i32, i32) {
    %c0_i32 = arith.constant 0 : i32
    %c0_i32_0 = arith.constant 0 : i32
    %c0_i32_1 = arith.constant 0 : i32
    return %c0_i32, %c0_i32_0 : i32, i32
  }
  func.func @transform_2(%arg0: i32) -> (i32, i32) {
    %c0_i32 = arith.constant 0 : i32
    %c0_i32_0 = arith.constant 0 : i32
    %c0_i32_1 = arith.constant 0 : i32
    return %c0_i32, %c0_i32_0 : i32, i32
  }
  func.func @transform_3(%arg0: i32) -> (i32, i32) {
    %c0_i32 = arith.constant 0 : i32
    %c0_i32_0 = arith.constant 0 : i32
    return %arg0, %c0_i32 : i32, i32
  }
}

</mosaic_0001>

<bundles_post_ra>
// kernel: rgcn_model_forward.3
= control target key start
LH: loop header
LB: loop body
LE: loop exit
PB: predicated region body
PF: predicated region fallthrough
CT: control target
= control target key end

     0   :  { %vm320_vm0 = vcmask 523264   ;;  %s1135_s2 = inlined_call_operand.vmem [shape: f32[128,512], index: 2, kind: input, shape index: {}]   ;;  %s1136_s1 = inlined_call_operand.vmem [shape: f32[64,128], index: 1, kind: input, shape index: {}]   ;;  %s1137_s0 = inlined_call_operand.vmem [shape: bf16[3,64,64], index: 0, kind: input, shape index: {}]   ;;  %s1138_s3 = inlined_call_operand.vmem [shape: f32[64,128], index: 3, kind: output, shape index: {}]  }
   0x1   :  { %v83_v0 = vld [vmem:[%s1135_s2 + $0x1e0] sm:$0xff]  ;;  %v84_v1 = vld [vmem:[%s1135_s2 + $0x1e8] sm:$0xff]  ;;  %v85_v2 = vld [vmem:[%s1135_s2 + $0x1f0] sm:$0xff] }
   0x2   :  { %703 = vmatpush.msra.mxu3 %v83_v0  ;;  %128 = vmatpush.msra.mxu1 %v84_v1  ;;  %v79_v3 = vld [vmem:[%s1135_s2 + $0x1c0] sm:$0xff]  ;;  %v80_v4 = vld [vmem:[%s1135_s2 + $0x1c8] sm:$0xff]  ;;  %v81_v5 = vld [vmem:[%s1135_s2 + $0x1d0] sm:$0xff] }
   0x3   :  { %169 = vmatpush.msra.mxu2 %v85_v2  ;;  %v75_v6 = vld [vmem:[%s1135_s2 + $0x1a0] sm:$0xff]  ;;  %v76_v7 = vld [vmem:[%s1135_s2 + $0x1a8] sm:$0xff]  ;;  %87 = vmatpush.msra.mxu0 %v83_v0  ;;  %v77_v8 = vld [vmem:[%s1135_s2 + $0x1b0] sm:$0xff] }
   0x4   :  { %704 = vmatpush.msra.mxu3 %v79_v3  ;;  %129 = vmatpush.msra.mxu1 %v80_v4  ;;  %v71_v9 = vld [vmem:[%s1135_s2 + $0x180] sm:$0xff]  ;;  %v72_v10 = vld [vmem:[%s1135_s2 + $0x188] sm:$0xff]  ;;  %v73_v11 = vld [vmem:[%s1135_s2 + $0x190] sm:$0xff] }
   0x5   :  { %170 = vmatpush.msra.mxu2 %v81_v5  ;;  %88 = vmatpush.msra.mxu0 %v79_v3  ;;  %v67_v12 = vld [vmem:[%s1135_s2 + $0x160] sm:$0xff]  ;;  %v68_v13 = vld [vmem:[%s1135_s2 + $0x168] sm:$0xff]  ;;  %v69_v14 = vld [vmem:[%s1135_s2 + $0x170] sm:$0xff] }
   0x6   :  { %705 = vmatpush.msra.mxu3 %v75_v6  ;;  %130 = vmatpush.msra.mxu1 %v76_v7  ;;  %v63_v15 = vld [vmem:[%s1135_s2 + $0x140] sm:$0xff]  ;;  %v64_v16 = vld [vmem:[%s1135_s2 + $0x148] sm:$0xff]  ;;  %v65_v17 = vld [vmem:[%s1135_s2 + $0x150] sm:$0xff] }
   0x7   :  { %171 = vmatpush.msra.mxu2 %v77_v8  ;;  %89 = vmatpush.msra.mxu0 %v75_v6  ;;  %v59_v18 = vld [vmem:[%s1135_s2 + $0x120] sm:$0xff]  ;;  %v60_v19 = vld [vmem:[%s1135_s2 + $0x128] sm:$0xff]  ;;  %v61_v20 = vld [vmem:[%s1135_s2 + $0x130] sm:$0xff] }
   0x8   :  { %706 = vmatpush.msra.mxu3 %v71_v9  ;;  %131 = vmatpush.msra.mxu1 %v72_v10  ;;  %v55_v21 = vld [vmem:[%s1135_s2 + $0x100] sm:$0xff]  ;;  %v56_v22 = vld [vmem:[%s1135_s2 + $0x108] sm:$0xff]  ;;  %v57_v23 = vld [vmem:[%s1135_s2 + $0x110] sm:$0xff] }
   0x9   :  { %172 = vmatpush.msra.mxu2 %v73_v11  ;;  %90 = vmatpush.msra.mxu0 %v71_v9  ;;  %v51_v24 = vld [vmem:[%s1135_s2 + $0xe0] sm:$0xff]  ;;  %v52_v25 = vld [vmem:[%s1135_s2 + $0xe8] sm:$0xff]  ;;  %v53_v26 = vld [vmem:[%s1135_s2 + $0xf0] sm:$0xff] }
   0xa   :  { %707 = vmatpush.msra.mxu3 %v67_v12  ;;  %132 = vmatpush.msra.mxu1 %v68_v13  ;;  %v47_v27 = vld [vmem:[%s1135_s2 + $0xc0] sm:$0xff]  ;;  %v48_v28 = vld [vmem:[%s1135_s2 + $0xc8] sm:$0xff]  ;;  %v49_v29 = vld [vmem:[%s1135_s2 + $0xd0] sm:$0xff] }
   0xb   :  { %173 = vmatpush.msra.mxu2 %v69_v14  ;;  %91 = vmatpush.msra.mxu0 %v67_v12  ;;  %v43_v30 = vld [vmem:[%s1135_s2 + $0xa0] sm:$0xff]  ;;  %v44_v31 = vld [vmem:[%s1135_s2 + $0xa8] sm:$0xff]  ;;  %v45_v32 = vld [vmem:[%s1135_s2 + $0xb0] sm:$0xff] }
   0xc   :  { %708 = vmatpush.msra.mxu3 %v63_v15  ;;  %133 = vmatpush.msra.mxu1 %v64_v16  ;;  %v39_v33 = vld [vmem:[%s1135_s2 + $0x80] sm:$0xff]  ;;  %v40_v34 = vld [vmem:[%s1135_s2 + $0x88] sm:$0xff]  ;;  %v41_v35 = vld [vmem:[%s1135_s2 + $0x90] sm:$0xff] }
   0xd   :  { %174 = vmatpush.msra.mxu2 %v65_v17  ;;  %92 = vmatpush.msra.mxu0 %v63_v15  ;;  %v35_v36 = vld [vmem:[%s1135_s2 + $0x60] sm:$0xff]  ;;  %v36_v37 = vld [vmem:[%s1135_s2 + $0x68] sm:$0xff]  ;;  %v37_v38 = vld [vmem:[%s1135_s2 + $0x70] sm:$0xff] }
   0xe   :  { %709 = vmatpush.msra.mxu3 %v59_v18  ;;  %134 = vmatpush.msra.mxu1 %v60_v19  ;;  %v31_v39 = vld [vmem:[%s1135_s2 + $0x40] sm:$0xff]  ;;  %v32_v40 = vld [vmem:[%s1135_s2 + $0x48] sm:$0xff]  ;;  %v33_v41 = vld [vmem:[%s1135_s2 + $0x50] sm:$0xff] }
   0xf   :  { %175 = vmatpush.msra.mxu2 %v61_v20  ;;  %93 = vmatpush.msra.mxu0 %v59_v18  ;;  %v27_v42 = vld [vmem:[%s1135_s2 + $0x20] sm:$0xff]  ;;  %v28_v43 = vld [vmem:[%s1135_s2 + $0x28] sm:$0xff]  ;;  %v29_v44 = vld [vmem:[%s1135_s2 + $0x30] sm:$0xff] }
  0x10   :  { %710 = vmatpush.msra.mxu3 %v55_v21  ;;  %135 = vmatpush.msra.mxu1 %v56_v22  ;;  %v23_v45 = vld [vmem:[%s1135_s2] sm:$0xff]  ;;  %v24_v46 = vld [vmem:[%s1135_s2 + $0x8] sm:$0xff]  ;;  %v25_v47 = vld [vmem:[%s1135_s2 + $0x10] sm:$0xff] }
  0x11   :  { %176 = vmatpush.msra.mxu2 %v57_v23  ;;  %94 = vmatpush.msra.mxu0 %v55_v21  ;;  %v902_v48 = vld [vmem:[%s1136_s1 + $0x10] sm:$0xff]  ;;  %v907_v49 = vld [vmem:[%s1136_s1] sm:$0xff]  ;;  %v916_v50 = vld [vmem:[%s1136_s1 + $0x18] sm:$0xff] }
  0x12   :  { %711 = vmatpush.msra.mxu3 %v51_v24  ;;  %136 = vmatpush.msra.mxu1 %v52_v25  ;;  %v921_v51 = vld [vmem:[%s1136_s1 + $0x8] sm:$0xff]  ;;  %v930_v52 = vld [vmem:[%s1136_s1 + $0x20] sm:$0xff]  ;;  %v946_v54 = vld [vmem:[%s1136_s1 + $0x30] sm:$0xff] }
  0x13   :  { %177 = vmatpush.msra.mxu2 %v53_v26  ;;  %95 = vmatpush.msra.mxu0 %v51_v24  ;;  %v938_v53 = vld [vmem:[%s1136_s1 + $0x28] sm:$0xff]  ;;  %v954_v55 = vld [vmem:[%s1136_s1 + $0x38] sm:$0xff] }
  0x14   :  { %712 = vmatpush.msra.mxu3 %v47_v27  ;;  %137 = vmatpush.msra.mxu1 %v48_v28  ;;  %v86_v56 = vld [vmem:[%s1135_s2 + $0x1f8] sm:$0xff] }
  0x15   :  { %178 = vmatpush.msra.mxu2 %v49_v29  ;;  %96 = vmatpush.msra.mxu0 %v47_v27  ;;  %v82_v57 = vld [vmem:[%s1135_s2 + $0x1d8] sm:$0xff]  ;;  %v645_v29 = vld [vmem:[%s1137_s0] sm:$0xff]  }
  0x16   :  { %713 = vmatpush.msra.mxu3 %v43_v30  ;;  %138 = vmatpush.msra.mxu1 %v44_v31  ;;  %v78_v58 = vld [vmem:[%s1135_s2 + $0x1b8] sm:$0xff] }
  0x17   :  { %179 = vmatpush.msra.mxu2 %v45_v32  ;;  %97 = vmatpush.msra.mxu0 %v43_v30  ;;  %v74_v59 = vld [vmem:[%s1135_s2 + $0x198] sm:$0xff]  ;;  %v646_v32 = vunpack.c.l.bf16 %v645_v29 }
  0x18   :  { %714 = vmatpush.msra.mxu3 %v39_v33  ;;  %139 = vmatpush.msra.mxu1 %v40_v34  ;;  %v70_v61 = vld [vmem:[%s1135_s2 + $0x178] sm:$0xff]  ;;  %v696_v34 = vld [vmem:[%s1137_s0 + $0x28] sm:$0xff]  }
  0x19   :  { %180 = vmatpush.msra.mxu2 %v41_v35  ;;  %98 = vmatpush.msra.mxu0 %v39_v33  ;;  %v66_v62 = vld [vmem:[%s1135_s2 + $0x158] sm:$0xff]  ;;  %v647_v35 = vunpack.c.h.bf16 %v645_v29 }
  0x1a   :  { %715 = vmatpush.msra.mxu3 %v35_v36  ;;  %140 = vmatpush.msra.mxu1 %v36_v37  ;;  %v62_v63 = vld [vmem:[%s1135_s2 + $0x138] sm:$0xff]  ;;  %v692_v37 = vld [vmem:[%s1137_s0 + $0x8] sm:$0xff]  }
  0x1b   :  { %181 = vmatpush.msra.mxu2 %v37_v38  ;;  %99 = vmatpush.msra.mxu0 %v35_v36  ;;  %v58_v2 = vld [vmem:[%s1135_s2 + $0x118] sm:$0xff]  ;;  %v666_v36 = vunpack.c.l.bf16 %v696_v34  ;;  %v700_v38 = vld [vmem:[%s1137_s0 + $0x48] sm:$0xff]  }
  0x1c   :  { %716 = vmatpush.msra.mxu3 %v31_v39  ;;  %141 = vmatpush.msra.mxu1 %v32_v40  ;;  %v54_v4 = vld [vmem:[%s1135_s2 + $0xf8] sm:$0xff]  ;;  %v682_v40 = vunpack.c.l.bf16 %v700_v38 }
  0x1d   :  { %182 = vmatpush.msra.mxu2 %v33_v41  ;;  %100 = vmatpush.msra.mxu0 %v31_v39  ;;  %v50_v5 = vld [vmem:[%s1135_s2 + $0xd8] sm:$0xff]  ;;  %v650_v39 = vunpack.c.l.bf16 %v692_v37  ;;  %v667_v41 = vunpack.c.h.bf16 %v696_v34 }
  0x1e   :  { %717 = vmatpush.msra.mxu3 %v27_v42  ;;  %142 = vmatpush.msra.mxu1 %v28_v43  ;;  %v46_v6 = vld [vmem:[%s1135_s2 + $0xb8] sm:$0xff]  ;;  %v651_v43 = vunpack.c.h.bf16 %v692_v37 }
  0x1f   :  { %183 = vmatpush.msra.mxu2 %v29_v44  ;;  %101 = vmatpush.msra.mxu0 %v27_v42  ;;  %v42_v9 = vld [vmem:[%s1135_s2 + $0x98] sm:$0xff]  ;;  %v697_v42 = vld [vmem:[%s1137_s0 + $0x30] sm:$0xff]   ;;  %v683_v44 = vunpack.c.h.bf16 %v700_v38 }
  0x20   :  { %718 = vmatpush.msra.mxu3 %v23_v45  ;;  %143 = vmatpush.msra.mxu1 %v24_v46  ;;  %v38_v11 = vld [vmem:[%s1135_s2 + $0x78] sm:$0xff]  ;;  %v693_v46 = vld [vmem:[%s1137_s0 + $0x10] sm:$0xff]  }
  0x21   :  { %184 = vmatpush.msra.mxu2 %v25_v47  ;;  %109 = vmatmul.f32.vlgmr.msra.gmra.mxu3 %v902_v48  ;;  %v34_v12 = vld [vmem:[%s1135_s2 + $0x58] sm:$0xff]  ;;  %v701_v47 = vld [vmem:[%s1137_s0 + $0x50] sm:$0xff]  }
  0x22   :  { %144 = vmatmul.f32.vlgmr.msra.gmra.mxu1 %v907_v49  ;;  %185 = vmatmul.f32.vlgmr.msra.gmra.mxu2 %v907_v49  ;;  %v30_v14 = vld [vmem:[%s1135_s2 + $0x38] sm:$0xff] }
  0x23   :  { %102 = vmatpush.msra.mxu0 %v23_v45  ;;  %210 = vmatpush.msrb.mxu3 %v86_v56  ;;  %v26_v16 = vld [vmem:[%s1135_s2 + $0x18] sm:$0xff]  ;;  %v670_v45 = vunpack.c.l.bf16 %v697_v42 }
  0x24   :  { %103 = vmatmul.f32.vlgmr.msra.gmra.mxu0 %v907_v49  ;;  %v702_v56 = vld [vmem:[%s1137_s0 + $0x58] sm:$0xff]  }
  0x25   :  { %211 = vmatpush.msrb.mxu3 %v82_v57 }
  0x27   :  { %212 = vmatpush.msrb.mxu3 %v78_v58  ;;  %v690_v58 = vunpack.c.l.bf16 %v702_v56 }
  0x29   :  { %112 = vmatmul.f32.gmra.mxu3 %v916_v50 }
  0x2a   :  { %147 = vmatmul.f32.gmra.mxu1 %v921_v51  ;;  %188 = vmatmul.f32.gmra.mxu2 %v921_v51 }
  0x2b   :  { %213 = vmatpush.msrb.mxu3 %v74_v59 }
  0x2c   :  { %106 = vmatmul.f32.gmra.mxu0 %v921_v51 }
  0x2d   :  { %214 = vmatpush.msrb.mxu3 %v70_v61  ;;  %v691_v61 = vunpack.c.h.bf16 %v702_v56 }
  0x2f   :  { %215 = vmatpush.msrb.mxu3 %v66_v62  ;;  %v695_v62 = vld [vmem:[%s1137_s0 + $0x20] sm:$0xff]  }
  0x31   :  { %115 = vmatmul.f32.gmra.mxu3 %v930_v52 }
  0x32   :  { %150 = vmatmul.f32.gmra.mxu1 %v902_v48  ;;  %191 = vmatmul.f32.gmra.mxu2 %v902_v48 }
  0x33   :  { %216 = vmatpush.msrb.mxu3 %v62_v63  ;;  %v662_v63 = vunpack.c.l.bf16 %v695_v62 }
  0x35   :  { %217 = vmatpush.msrb.mxu3 %v58_v2 }
  0x37   :  { %218 = vmatpush.msrb.mxu3 %v54_v4 }
  0x39   :  { %118 = vmatmul.f32.gmra.mxu3 %v938_v53 }
  0x3a   :  { %153 = vmatmul.f32.gmra.mxu1 %v916_v50  ;;  %194 = vmatmul.f32.gmra.mxu2 %v916_v50 }
  0x3b   :  { %219 = vmatpush.msrb.mxu3 %v50_v5 }
  0x3d   :  { %220 = vmatpush.msrb.mxu3 %v46_v6 }
  0x3f   :  { %221 = vmatpush.msrb.mxu3 %v42_v9 }
  0x41   :  { %121 = vmatmul.f32.gmra.mxu3 %v946_v54 }
  0x42   :  { %156 = vmatmul.f32.gmra.mxu1 %v930_v52  ;;  %197 = vmatmul.f32.gmra.mxu2 %v930_v52 }
  0x43   :  { %222 = vmatpush.msrb.mxu3 %v38_v11 }
  0x45   :  { %223 = vmatpush.msrb.mxu3 %v34_v12 }
  0x47   :  { %224 = vmatpush.msrb.mxu3 %v30_v14 }
  0x49   :  { %124 = vmatmul.f32.gmra.mxu3 %v954_v55 }
  0x4a   :  { %159 = vmatmul.f32.gmra.mxu1 %v938_v53  ;;  %200 = vmatmul.f32.gmra.mxu2 %v938_v53 }
  0x4b   :  { %225 = vmatpush.msrb.mxu3 %v26_v16 }
  0x51   :  { %226 = vmatmul.f32.vlgmr.msrb.gmra.mxu3 %v907_v49  ;;  %v686_v49 = vunpack.c.l.bf16 %v701_v47 }
  0x52   :  { %162 = vmatmul.f32.gmra.mxu1 %v946_v54  ;;  %203 = vmatmul.f32.gmra.mxu2 %v946_v54 }
  0x59   :  { %229 = vmatmul.f32.gmra.mxu3 %v921_v51  ;;  %v698_v51 = vld [vmem:[%s1137_s0 + $0x38] sm:$0xff]  }
  0x5a   :  { %165 = vmatmul.f32.gmra.mxu1 %v954_v55  ;;  %206 = vmatmul.f32.gmra.mxu2 %v954_v55  ;;  %v675_v59 = vunpack.c.h.bf16 %v698_v51 }
  0x61   :  { %232 = vmatmul.f32.gmra.mxu3 %v902_v48  ;;  %v654_v48 = vunpack.c.l.bf16 %v693_v46 }
  0x69   :  { %235 = vmatmul.f32.gmra.mxu3 %v916_v50  ;;  %v671_v50 = vunpack.c.h.bf16 %v697_v42 }
  0x71   :  { %238 = vmatmul.f32.gmra.mxu3 %v930_v52  ;;  %v655_v52 = vunpack.c.h.bf16 %v693_v46 }
  0x79   :  { %241 = vmatmul.f32.gmra.mxu3 %v938_v53  ;;  %v687_v53 = vunpack.c.h.bf16 %v701_v47 }
  0x81   :  { %244 = vmatmul.f32.gmra.mxu3 %v946_v54  ;;  %v674_v54 = vunpack.c.l.bf16 %v698_v51 }
  0x89   :  { %247 = vmatmul.f32.gmra.mxu3 %v954_v55  ;;  %v694_v55 = vld [vmem:[%s1137_s0 + $0x18] sm:$0xff]  }
  0x8a   :  { %v658_v57 = vunpack.c.l.bf16 %v694_v55 }
  0x9f   :  { %v975_v60 = vpop.f32.mrf.mxu1 }
  0xa1   :  { %v104_v25 = vpop.f32.mrf.mxu0 }
  0xa4   :  { %v110_v0 = vpop.f32.mrf.mxu3 }
  0xa5   :  { %v986_v1 = vpop.f32.mrf.mxu2 }
  0xa7   :  { %v991_v3 = vpop.f32.mrf.mxu1 }
  0xa9   :  { %v107_v30 = vpop.f32.mrf.mxu0 }
  0xac   :  { %v113_v7 = vpop.f32.mrf.mxu3 }
  0xad   :  { %v1002_v8 = vpop.f32.mrf.mxu2 }
  0xaf   :  { %v1007_v10 = vpop.f32.mrf.mxu1 }
  0xb4   :  { %v116_v13 = vpop.f32.mrf.mxu3 }
  0xb5   :  { %v1018_v15 = vpop.f32.mrf.mxu2 }
  0xb7   :  { %v154_v17 = vpop.f32.mrf.mxu1 }
  0xbc   :  { %v119_v18 = vpop.f32.mrf.mxu3 }
  0xbd   :  { %v1024_v19 = vpop.f32.mrf.mxu2 }
  0xbf   :  { %v157_v20 = vpop.f32.mrf.mxu1 }
  0xc4   :  { %v122_v21 = vpop.f32.mrf.mxu3 }
  0xc5   :  { %v1027_v22 = vpop.f32.mrf.mxu2 }
  0xc7   :  { %v160_v23 = vpop.f32.mrf.mxu1 }
  0xcc   :  { %v125_v24 = vpop.f32.mrf.mxu3 }
  0xcd   :  { %v201_v26 = vpop.f32.mrf.mxu2  ;;  %353 = vmatpush.msrb.mxu0 %v125_v24 }
  0xcf   :  { %v163_v27 = vpop.f32.mrf.mxu1  ;;  %354 = vmatpush.msrb.mxu0 %v122_v21 }
  0xd1   :  { %355 = vmatpush.msrb.mxu0 %v119_v18 }
  0xd3   :  { %356 = vmatpush.msrb.mxu0 %v116_v13 }
  0xd4   :  { %v227_v4 = vpop.f32.mrf.mxu3 }
  0xd5   :  { %v204_v28 = vpop.f32.mrf.mxu2  ;;  %357 = vmatpush.msrb.mxu0 %v113_v7 }
  0xd7   :  { %v166_v31 = vpop.f32.mrf.mxu1  ;;  %358 = vmatpush.msrb.mxu0 %v110_v0  ;;  %v663_v0 = vunpack.c.h.bf16 %v695_v62 }
  0xd8   :  { %719 = vmatpush.msrb.mxu1 %v166_v31 }
  0xd9   :  { %359 = vmatpush.msrb.mxu0 %v107_v30 }
  0xda   :  { %720 = vmatpush.msrb.mxu1 %v163_v27 }
  0xdb   :  { %360 = vmatpush.msrb.mxu0 %v104_v25 }
  0xdc   :  { %721 = vmatpush.msrb.mxu1 %v160_v23  ;;  %604 = vmatmul.msk.f32.vlgmr.msrb.gmra.mxu0 %vm320_vm0, %v646_v32  ;;  %v230_v5 = vpop.f32.mrf.mxu3 }
  0xdd   :  { %v207_v33 = vpop.f32.mrf.mxu2  ;;  %451 = vmatpush.msra.mxu0 %v166_v31 }
  0xde   :  { %722 = vmatpush.msrb.mxu1 %v157_v20  ;;  %727 = vmatpush.msrb.mxu2 %v207_v33 }
  0xdf   :  { %452 = vmatpush.msra.mxu0 %v163_v27 }
  0xe0   :  { %723 = vmatpush.msrb.mxu1 %v154_v17  ;;  %728 = vmatpush.msrb.mxu2 %v204_v28 }
  0xe1   :  { %453 = vmatpush.msra.mxu0 %v160_v23 }
  0xe2   :  { %724 = vmatpush.msrb.mxu1 %v1007_v10  ;;  %729 = vmatpush.msrb.mxu2 %v201_v26 }
  0xe3   :  { %454 = vmatpush.msra.mxu0 %v157_v20 }
  0xe4   :  { %725 = vmatpush.msrb.mxu1 %v991_v3  ;;  %730 = vmatpush.msrb.mxu2 %v1027_v22 }
  0xe5   :  { %605 = vmatmul.msk.f32.gmra.mxu0 %vm320_vm0, %v647_v35 }
  0xe6   :  { %455 = vmatpush.msra.mxu0 %v154_v17  ;;  %726 = vmatpush.msrb.mxu1 %v975_v60 }
  0xe7   :  { %731 = vmatpush.msrb.mxu2 %v1024_v19  ;;  %622 = vmatmul.msk.f32.vlgmr.msrb.gmra.mxu1 %vm320_vm0, %v666_v36 }
  0xe8   :  { %456 = vmatpush.msra.mxu0 %v1007_v10 }
  0xe9   :  { %732 = vmatpush.msrb.mxu2 %v1018_v15 }
  0xea   :  { %457 = vmatpush.msra.mxu0 %v991_v3 }
  0xeb   :  { %733 = vmatpush.msrb.mxu2 %v1002_v8 }
  0xec   :  { %458 = vmatpush.msra.mxu0 %v975_v60  ;;  %v659_v60 = vunpack.c.h.bf16 %v694_v55 }
  0xed   :  { %734 = vmatpush.msrb.mxu2 %v986_v1  ;;  %606 = vmatmul.msk.f32.gmra.mxu0 %vm320_vm0, %v650_v39 }
  0xee   :  { %549 = vmatpush.msrb.mxu0 %v207_v33  ;;  %638 = vmatmul.msk.f32.vlgmr.msrb.gmra.mxu2 %vm320_vm0, %v682_v40 }
  0xef   :  { %623 = vmatmul.msk.f32.gmra.mxu1 %vm320_vm0, %v667_v41 }
  0xf0   :  { %550 = vmatpush.msrb.mxu0 %v204_v28 }
  0xf2   :  { %551 = vmatpush.msrb.mxu0 %v201_v26 }
  0xf4   :  { %552 = vmatpush.msrb.mxu0 %v1027_v22 }
  0xf5   :  { %607 = vmatmul.msk.f32.gmra.mxu0 %vm320_vm0, %v651_v43 }
  0xf6   :  { %553 = vmatpush.msrb.mxu0 %v1024_v19  ;;  %639 = vmatmul.msk.f32.gmra.mxu2 %vm320_vm0, %v683_v44 }
  0xf7   :  { %624 = vmatmul.msk.f32.gmra.mxu1 %vm320_vm0, %v670_v45 }
  0xf8   :  { %554 = vmatpush.msrb.mxu0 %v1018_v15 }
  0xfa   :  { %555 = vmatpush.msrb.mxu0 %v1002_v8  ;;  %v233_v8 = vpop.f32.mrf.mxu3 }
  0xfc   :  { %556 = vmatpush.msrb.mxu0 %v986_v1  ;;  %v699_v1 = vld [vmem:[%s1137_s0 + $0x40] sm:$0xff]  }
  0xfd   :  { %608 = vmatmul.msk.f32.gmra.mxu0 %vm320_vm0, %v654_v48  ;;  %v678_v2 = vunpack.c.l.bf16 %v699_v1  ;;  %v679_v3 = vunpack.c.h.bf16 %v699_v1 }
  0xfe   :  { %640 = vmatmul.msk.f32.gmra.mxu2 %vm320_vm0, %v686_v49 }
  0xff   :  { %625 = vmatmul.msk.f32.gmra.mxu1 %vm320_vm0, %v671_v50 }
 0x102   :  { %v236_v12 = vpop.f32.mrf.mxu3 }
 0x105   :  { %609 = vmatmul.msk.f32.gmra.mxu0 %vm320_vm0, %v655_v52 }
 0x106   :  { %641 = vmatmul.msk.f32.gmra.mxu2 %vm320_vm0, %v687_v53 }
 0x107   :  { %626 = vmatmul.msk.f32.gmra.mxu1 %vm320_vm0, %v674_v54 }
 0x10a   :  { %v239_v20 = vpop.f32.mrf.mxu3 }
 0x10d   :  { %610 = vmatmul.msk.f32.gmra.mxu0 %vm320_vm0, %v658_v57 }
 0x10e   :  { %642 = vmatmul.msk.f32.gmra.mxu2 %vm320_vm0, %v690_v58 }
 0x10f   :  { %627 = vmatmul.msk.f32.gmra.mxu1 %vm320_vm0, %v675_v59 }
 0x112   :  { %v242_v28 = vpop.f32.mrf.mxu3 }
 0x115   :  { %611 = vmatmul.msk.f32.gmra.mxu0 %vm320_vm0, %v659_v60 }
 0x116   :  { %643 = vmatmul.msk.f32.gmra.mxu2 %vm320_vm0, %v691_v61 }
 0x11a   :  { %v245_v35 = vpop.f32.mrf.mxu3 }
 0x11d   :  { %620 = vmatmul.msk.f32.vlgmr.msra.gmra.mxu0 %vm320_vm0, %v662_v63 }
 0x122   :  { %v248_v44 = vpop.f32.mrf.mxu3 }
 0x125   :  { %621 = vmatmul.msk.f32.gmra.mxu0 %vm320_vm0, %v663_v0 }
 0x12d   :  { %636 = vmatmul.msk.f32.vlgmr.msrb.gmra.mxu0 %vm320_vm0, %v678_v2 }
 0x135   :  { %637 = vmatmul.msk.f32.gmra.mxu0 %vm320_vm0, %v679_v3 }
 0x159   :  { %v362_v6 = vpop.f32.mrf.mxu0 }
 0x15a   :  { %v386_v7 = vadd.f32 %v362_v6, %v227_v4 }
 0x162   :  { %v365_v9 = vpop.f32.mrf.mxu0 }
 0x163   :  { %v387_v10 = vadd.f32 %v365_v9, %v230_v5 }
 0x164   :  { %v466_v11 = vpop.f32.mrf.mxu1 }
 0x16a   :  { %v368_v13 = vpop.f32.mrf.mxu0 }
 0x16b   :  { %v388_v14 = vadd.f32 %v368_v13, %v233_v8 }
 0x16c   :  { %v469_v15 = vpop.f32.mrf.mxu1 }
 0x16d   :  { %v486_v16 = vadd.f32 %v466_v11, %v388_v14 }
 0x171   :  { %v564_v17 = vpop.f32.mrf.mxu2 }
 0x172   :  { %v584_v18 = vadd.f32 %v564_v17, %v486_v16  ;;  %v371_v19 = vpop.f32.mrf.mxu0 }
 0x173   :  { %v389_v21 = vadd.f32 %v371_v19, %v236_v12 }
 0x174   :  { %592 = vst [vmem:[%s1138_s3 + $0x10] sm:$0xff] %v584_v18  ;;  %v472_v22 = vpop.f32.mrf.mxu1 }
 0x175   :  { %v487_v23 = vadd.f32 %v469_v15, %v389_v21 }
 0x179   :  { %v567_v24 = vpop.f32.mrf.mxu2 }
 0x17a   :  { %v585_v25 = vadd.f32 %v567_v24, %v487_v23  ;;  %v374_v26 = vpop.f32.mrf.mxu0 }
 0x17b   :  { %v390_v27 = vadd.f32 %v374_v26, %v239_v20 }
 0x17c   :  { %593 = vst [vmem:[%s1138_s3 + $0x18] sm:$0xff] %v585_v25  ;;  %v475_v31 = vpop.f32.mrf.mxu1 }
 0x17d   :  { %v488_v29 = vadd.f32 %v472_v22, %v390_v27 }
 0x181   :  { %v570_v30 = vpop.f32.mrf.mxu2 }
 0x182   :  { %v586_v32 = vadd.f32 %v570_v30, %v488_v29  ;;  %v377_v33 = vpop.f32.mrf.mxu0 }
 0x183   :  { %v391_v34 = vadd.f32 %v377_v33, %v242_v28 }
 0x184   :  { %594 = vst [vmem:[%s1138_s3 + $0x20] sm:$0xff] %v586_v32  ;;  %v478_v40 = vpop.f32.mrf.mxu1 }
 0x185   :  { %v489_v36 = vadd.f32 %v475_v31, %v391_v34 }
 0x189   :  { %v573_v37 = vpop.f32.mrf.mxu2 }
 0x18a   :  { %v587_v38 = vadd.f32 %v573_v37, %v489_v36  ;;  %v380_v39 = vpop.f32.mrf.mxu0 }
 0x18b   :  { %v392_v41 = vadd.f32 %v380_v39, %v245_v35 }
 0x18c   :  { %595 = vst [vmem:[%s1138_s3 + $0x28] sm:$0xff] %v587_v38  ;;  %v481_v48 = vpop.f32.mrf.mxu1 }
 0x18d   :  { %v490_v42 = vadd.f32 %v478_v40, %v392_v41 }
 0x191   :  { %v576_v43 = vpop.f32.mrf.mxu2 }
 0x192   :  { %v588_v45 = vadd.f32 %v576_v43, %v490_v42  ;;  %v383_v46 = vpop.f32.mrf.mxu0 }
 0x193   :  { %v393_v47 = vadd.f32 %v383_v46, %v248_v44 }
 0x194   :  { %596 = vst [vmem:[%s1138_s3 + $0x30] sm:$0xff] %v588_v45 }
 0x195   :  { %v491_v49 = vadd.f32 %v481_v48, %v393_v47 }
 0x199   :  { %v579_v50 = vpop.f32.mrf.mxu2 }
 0x19a   :  { %v589_v51 = vadd.f32 %v579_v50, %v491_v49  ;;  %v460_v52 = vpop.f32.mrf.mxu0 }
 0x19b   :  { %v484_v54 = vadd.f32 %v460_v52, %v386_v7 }
 0x19c   :  { %597 = vst [vmem:[%s1138_s3 + $0x38] sm:$0xff] %v589_v51 }
 0x1a2   :  { %v463_v53 = vpop.f32.mrf.mxu0 }
 0x1a3   :  { %v485_v57 = vadd.f32 %v463_v53, %v387_v10 }
 0x1aa   :  { %v558_v55 = vpop.f32.mrf.mxu0 }
 0x1ab   :  { %v582_v56 = vadd.f32 %v558_v55, %v484_v54 }
 0x1ad   :  { %590 = vst [vmem:[%s1138_s3] sm:$0xff] %v582_v56 }
 0x1b2   :  { %v561_v58 = vpop.f32.mrf.mxu0 }
 0x1b3   :  { %v583_v59 = vadd.f32 %v561_v58, %v485_v57 }
 0x1b5   :  { %591 = vst [vmem:[%s1138_s3 + $0x8] sm:$0xff] %v583_v59 }

// kernel: rgcn_model_forward.2
= control target key start
LH: loop header
LB: loop body
LE: loop exit
PB: predicated region body
PF: predicated region fallthrough
CT: control target
= control target key end

     0   :  { %vm320_vm0 = vcmask 523264   ;;  %s1160_s2 = inlined_call_operand.vmem [shape: f32[128,512], index: 2, kind: input, shape index: {}]   ;;  %s1161_s1 = inlined_call_operand.vmem [shape: f32[64,128], index: 1, kind: input, shape index: {}]   ;;  %s1162_s0 = inlined_call_operand.vmem [shape: bf16[3,64,64], index: 0, kind: input, shape index: {}]   ;;  %s1163_s3 = inlined_call_operand.vmem [shape: f32[64,128], index: 3, kind: output, shape index: {}]  }
   0x1   :  { %v83_v0 = vld [vmem:[%s1160_s2 + $0x1e0] sm:$0xff]  ;;  %v84_v1 = vld [vmem:[%s1160_s2 + $0x1e8] sm:$0xff]  ;;  %v85_v2 = vld [vmem:[%s1160_s2 + $0x1f0] sm:$0xff] }
   0x2   :  { %720 = vmatpush.msra.mxu3 %v83_v0  ;;  %128 = vmatpush.msra.mxu1 %v84_v1  ;;  %v79_v3 = vld [vmem:[%s1160_s2 + $0x1c0] sm:$0xff]  ;;  %v80_v4 = vld [vmem:[%s1160_s2 + $0x1c8] sm:$0xff]  ;;  %v81_v5 = vld [vmem:[%s1160_s2 + $0x1d0] sm:$0xff] }
   0x3   :  { %169 = vmatpush.msra.mxu2 %v85_v2  ;;  %v75_v6 = vld [vmem:[%s1160_s2 + $0x1a0] sm:$0xff]  ;;  %v76_v7 = vld [vmem:[%s1160_s2 + $0x1a8] sm:$0xff]  ;;  %87 = vmatpush.msra.mxu0 %v83_v0  ;;  %v77_v8 = vld [vmem:[%s1160_s2 + $0x1b0] sm:$0xff] }
   0x4   :  { %721 = vmatpush.msra.mxu3 %v79_v3  ;;  %129 = vmatpush.msra.mxu1 %v80_v4  ;;  %v71_v9 = vld [vmem:[%s1160_s2 + $0x180] sm:$0xff]  ;;  %v72_v10 = vld [vmem:[%s1160_s2 + $0x188] sm:$0xff]  ;;  %v73_v11 = vld [vmem:[%s1160_s2 + $0x190] sm:$0xff] }
   0x5   :  { %170 = vmatpush.msra.mxu2 %v81_v5  ;;  %88 = vmatpush.msra.mxu0 %v79_v3  ;;  %v67_v12 = vld [vmem:[%s1160_s2 + $0x160] sm:$0xff]  ;;  %v68_v13 = vld [vmem:[%s1160_s2 + $0x168] sm:$0xff]  ;;  %v69_v14 = vld [vmem:[%s1160_s2 + $0x170] sm:$0xff] }
   0x6   :  { %722 = vmatpush.msra.mxu3 %v75_v6  ;;  %130 = vmatpush.msra.mxu1 %v76_v7  ;;  %v63_v15 = vld [vmem:[%s1160_s2 + $0x140] sm:$0xff]  ;;  %v64_v16 = vld [vmem:[%s1160_s2 + $0x148] sm:$0xff]  ;;  %v65_v17 = vld [vmem:[%s1160_s2 + $0x150] sm:$0xff] }
   0x7   :  { %171 = vmatpush.msra.mxu2 %v77_v8  ;;  %89 = vmatpush.msra.mxu0 %v75_v6  ;;  %v59_v18 = vld [vmem:[%s1160_s2 + $0x120] sm:$0xff]  ;;  %v60_v19 = vld [vmem:[%s1160_s2 + $0x128] sm:$0xff]  ;;  %v61_v20 = vld [vmem:[%s1160_s2 + $0x130] sm:$0xff] }
   0x8   :  { %723 = vmatpush.msra.mxu3 %v71_v9  ;;  %131 = vmatpush.msra.mxu1 %v72_v10  ;;  %v55_v21 = vld [vmem:[%s1160_s2 + $0x100] sm:$0xff]  ;;  %v56_v22 = vld [vmem:[%s1160_s2 + $0x108] sm:$0xff]  ;;  %v57_v23 = vld [vmem:[%s1160_s2 + $0x110] sm:$0xff] }
   0x9   :  { %172 = vmatpush.msra.mxu2 %v73_v11  ;;  %90 = vmatpush.msra.mxu0 %v71_v9  ;;  %v51_v24 = vld [vmem:[%s1160_s2 + $0xe0] sm:$0xff]  ;;  %v52_v25 = vld [vmem:[%s1160_s2 + $0xe8] sm:$0xff]  ;;  %v53_v26 = vld [vmem:[%s1160_s2 + $0xf0] sm:$0xff] }
   0xa   :  { %724 = vmatpush.msra.mxu3 %v67_v12  ;;  %132 = vmatpush.msra.mxu1 %v68_v13  ;;  %v47_v27 = vld [vmem:[%s1160_s2 + $0xc0] sm:$0xff]  ;;  %v48_v28 = vld [vmem:[%s1160_s2 + $0xc8] sm:$0xff]  ;;  %v49_v29 = vld [vmem:[%s1160_s2 + $0xd0] sm:$0xff] }
   0xb   :  { %173 = vmatpush.msra.mxu2 %v69_v14  ;;  %91 = vmatpush.msra.mxu0 %v67_v12  ;;  %v43_v30 = vld [vmem:[%s1160_s2 + $0xa0] sm:$0xff]  ;;  %v44_v31 = vld [vmem:[%s1160_s2 + $0xa8] sm:$0xff]  ;;  %v45_v32 = vld [vmem:[%s1160_s2 + $0xb0] sm:$0xff] }
   0xc   :  { %725 = vmatpush.msra.mxu3 %v63_v15  ;;  %133 = vmatpush.msra.mxu1 %v64_v16  ;;  %v39_v33 = vld [vmem:[%s1160_s2 + $0x80] sm:$0xff]  ;;  %v40_v34 = vld [vmem:[%s1160_s2 + $0x88] sm:$0xff]  ;;  %v41_v35 = vld [vmem:[%s1160_s2 + $0x90] sm:$0xff] }
   0xd   :  { %174 = vmatpush.msra.mxu2 %v65_v17  ;;  %92 = vmatpush.msra.mxu0 %v63_v15  ;;  %v35_v36 = vld [vmem:[%s1160_s2 + $0x60] sm:$0xff]  ;;  %v36_v37 = vld [vmem:[%s1160_s2 + $0x68] sm:$0xff]  ;;  %v37_v38 = vld [vmem:[%s1160_s2 + $0x70] sm:$0xff] }
   0xe   :  { %726 = vmatpush.msra.mxu3 %v59_v18  ;;  %134 = vmatpush.msra.mxu1 %v60_v19  ;;  %v31_v39 = vld [vmem:[%s1160_s2 + $0x40] sm:$0xff]  ;;  %v32_v40 = vld [vmem:[%s1160_s2 + $0x48] sm:$0xff]  ;;  %v33_v41 = vld [vmem:[%s1160_s2 + $0x50] sm:$0xff] }
   0xf   :  { %175 = vmatpush.msra.mxu2 %v61_v20  ;;  %93 = vmatpush.msra.mxu0 %v59_v18  ;;  %v27_v42 = vld [vmem:[%s1160_s2 + $0x20] sm:$0xff]  ;;  %v28_v43 = vld [vmem:[%s1160_s2 + $0x28] sm:$0xff]  ;;  %v29_v44 = vld [vmem:[%s1160_s2 + $0x30] sm:$0xff] }
  0x10   :  { %727 = vmatpush.msra.mxu3 %v55_v21  ;;  %135 = vmatpush.msra.mxu1 %v56_v22  ;;  %v23_v45 = vld [vmem:[%s1160_s2] sm:$0xff]  ;;  %v24_v46 = vld [vmem:[%s1160_s2 + $0x8] sm:$0xff]  ;;  %v25_v47 = vld [vmem:[%s1160_s2 + $0x10] sm:$0xff] }
  0x11   :  { %176 = vmatpush.msra.mxu2 %v57_v23  ;;  %94 = vmatpush.msra.mxu0 %v55_v21  ;;  %v919_v48 = vld [vmem:[%s1161_s1 + $0x10] sm:$0xff]  ;;  %v924_v49 = vld [vmem:[%s1161_s1] sm:$0xff]  ;;  %v933_v50 = vld [vmem:[%s1161_s1 + $0x18] sm:$0xff] }
  0x12   :  { %728 = vmatpush.msra.mxu3 %v51_v24  ;;  %136 = vmatpush.msra.mxu1 %v52_v25  ;;  %v938_v51 = vld [vmem:[%s1161_s1 + $0x8] sm:$0xff]  ;;  %v947_v52 = vld [vmem:[%s1161_s1 + $0x20] sm:$0xff]  ;;  %v963_v54 = vld [vmem:[%s1161_s1 + $0x30] sm:$0xff] }
  0x13   :  { %177 = vmatpush.msra.mxu2 %v53_v26  ;;  %95 = vmatpush.msra.mxu0 %v51_v24  ;;  %v955_v53 = vld [vmem:[%s1161_s1 + $0x28] sm:$0xff]  ;;  %v971_v55 = vld [vmem:[%s1161_s1 + $0x38] sm:$0xff] }
  0x14   :  { %729 = vmatpush.msra.mxu3 %v47_v27  ;;  %137 = vmatpush.msra.mxu1 %v48_v28  ;;  %v86_v56 = vld [vmem:[%s1160_s2 + $0x1f8] sm:$0xff] }
  0x15   :  { %178 = vmatpush.msra.mxu2 %v49_v29  ;;  %96 = vmatpush.msra.mxu0 %v47_v27  ;;  %v82_v57 = vld [vmem:[%s1160_s2 + $0x1d8] sm:$0xff]  ;;  %v662_v29 = vld [vmem:[%s1162_s0] sm:$0xff]  }
  0x16   :  { %730 = vmatpush.msra.mxu3 %v43_v30  ;;  %138 = vmatpush.msra.mxu1 %v44_v31  ;;  %v78_v58 = vld [vmem:[%s1160_s2 + $0x1b8] sm:$0xff] }
  0x17   :  { %179 = vmatpush.msra.mxu2 %v45_v32  ;;  %97 = vmatpush.msra.mxu0 %v43_v30  ;;  %v74_v59 = vld [vmem:[%s1160_s2 + $0x198] sm:$0xff]  ;;  %v663_v32 = vunpack.c.l.bf16 %v662_v29 }
  0x18   :  { %731 = vmatpush.msra.mxu3 %v39_v33  ;;  %139 = vmatpush.msra.mxu1 %v40_v34  ;;  %v70_v61 = vld [vmem:[%s1160_s2 + $0x178] sm:$0xff]  ;;  %v713_v34 = vld [vmem:[%s1162_s0 + $0x28] sm:$0xff]  }
  0x19   :  { %180 = vmatpush.msra.mxu2 %v41_v35  ;;  %98 = vmatpush.msra.mxu0 %v39_v33  ;;  %v66_v62 = vld [vmem:[%s1160_s2 + $0x158] sm:$0xff]  ;;  %v664_v35 = vunpack.c.h.bf16 %v662_v29 }
  0x1a   :  { %732 = vmatpush.msra.mxu3 %v35_v36  ;;  %140 = vmatpush.msra.mxu1 %v36_v37  ;;  %v62_v63 = vld [vmem:[%s1160_s2 + $0x138] sm:$0xff]  ;;  %v709_v37 = vld [vmem:[%s1162_s0 + $0x8] sm:$0xff]  }
  0x1b   :  { %181 = vmatpush.msra.mxu2 %v37_v38  ;;  %99 = vmatpush.msra.mxu0 %v35_v36  ;;  %v58_v2 = vld [vmem:[%s1160_s2 + $0x118] sm:$0xff]  ;;  %v683_v36 = vunpack.c.l.bf16 %v713_v34  ;;  %v717_v38 = vld [vmem:[%s1162_s0 + $0x48] sm:$0xff]  }
  0x1c   :  { %733 = vmatpush.msra.mxu3 %v31_v39  ;;  %141 = vmatpush.msra.mxu1 %v32_v40  ;;  %v54_v4 = vld [vmem:[%s1160_s2 + $0xf8] sm:$0xff]  ;;  %v699_v40 = vunpack.c.l.bf16 %v717_v38 }
  0x1d   :  { %182 = vmatpush.msra.mxu2 %v33_v41  ;;  %100 = vmatpush.msra.mxu0 %v31_v39  ;;  %v50_v5 = vld [vmem:[%s1160_s2 + $0xd8] sm:$0xff]  ;;  %v667_v39 = vunpack.c.l.bf16 %v709_v37  ;;  %v684_v41 = vunpack.c.h.bf16 %v713_v34 }
  0x1e   :  { %734 = vmatpush.msra.mxu3 %v27_v42  ;;  %142 = vmatpush.msra.mxu1 %v28_v43  ;;  %v46_v6 = vld [vmem:[%s1160_s2 + $0xb8] sm:$0xff]  ;;  %v668_v43 = vunpack.c.h.bf16 %v709_v37 }
  0x1f   :  { %183 = vmatpush.msra.mxu2 %v29_v44  ;;  %101 = vmatpush.msra.mxu0 %v27_v42  ;;  %v42_v9 = vld [vmem:[%s1160_s2 + $0x98] sm:$0xff]  ;;  %v714_v42 = vld [vmem:[%s1162_s0 + $0x30] sm:$0xff]   ;;  %v700_v44 = vunpack.c.h.bf16 %v717_v38 }
  0x20   :  { %735 = vmatpush.msra.mxu3 %v23_v45  ;;  %143 = vmatpush.msra.mxu1 %v24_v46  ;;  %v38_v11 = vld [vmem:[%s1160_s2 + $0x78] sm:$0xff]  ;;  %v710_v46 = vld [vmem:[%s1162_s0 + $0x10] sm:$0xff]  }
  0x21   :  { %184 = vmatpush.msra.mxu2 %v25_v47  ;;  %109 = vmatmul.f32.vlgmr.msra.gmra.mxu3 %v919_v48  ;;  %v34_v12 = vld [vmem:[%s1160_s2 + $0x58] sm:$0xff]  ;;  %v718_v47 = vld [vmem:[%s1162_s0 + $0x50] sm:$0xff]  }
  0x22   :  { %144 = vmatmul.f32.vlgmr.msra.gmra.mxu1 %v924_v49  ;;  %185 = vmatmul.f32.vlgmr.msra.gmra.mxu2 %v924_v49  ;;  %v30_v14 = vld [vmem:[%s1160_s2 + $0x38] sm:$0xff] }
  0x23   :  { %102 = vmatpush.msra.mxu0 %v23_v45  ;;  %210 = vmatpush.msrb.mxu3 %v86_v56  ;;  %v26_v16 = vld [vmem:[%s1160_s2 + $0x18] sm:$0xff]  ;;  %v687_v45 = vunpack.c.l.bf16 %v714_v42  ;;  %v671_v56 = vunpack.c.l.bf16 %v710_v46 }
  0x24   :  { %103 = vmatmul.f32.vlgmr.msra.gmra.mxu0 %v924_v49 }
  0x25   :  { %211 = vmatpush.msrb.mxu3 %v82_v57  ;;  %v703_v57 = vunpack.c.l.bf16 %v718_v47 }
  0x27   :  { %212 = vmatpush.msrb.mxu3 %v78_v58  ;;  %v688_v58 = vunpack.c.h.bf16 %v714_v42 }
  0x29   :  { %112 = vmatmul.f32.gmra.mxu3 %v933_v50 }
  0x2a   :  { %147 = vmatmul.f32.gmra.mxu1 %v938_v51  ;;  %188 = vmatmul.f32.gmra.mxu2 %v938_v51 }
  0x2b   :  { %213 = vmatpush.msrb.mxu3 %v74_v59  ;;  %v715_v59 = vld [vmem:[%s1162_s0 + $0x38] sm:$0xff]  }
  0x2c   :  { %106 = vmatmul.f32.gmra.mxu0 %v938_v51 }
  0x2d   :  { %214 = vmatpush.msrb.mxu3 %v70_v61  ;;  %v704_v61 = vunpack.c.h.bf16 %v718_v47 }
  0x2f   :  { %215 = vmatpush.msrb.mxu3 %v66_v62  ;;  %v691_v62 = vunpack.c.l.bf16 %v715_v59 }
  0x31   :  { %115 = vmatmul.f32.gmra.mxu3 %v947_v52 }
  0x32   :  { %150 = vmatmul.f32.gmra.mxu1 %v919_v48  ;;  %191 = vmatmul.f32.gmra.mxu2 %v919_v48 }
  0x33   :  { %216 = vmatpush.msrb.mxu3 %v62_v63  ;;  %v711_v63 = vld [vmem:[%s1162_s0 + $0x18] sm:$0xff]  }
  0x35   :  { %217 = vmatpush.msrb.mxu3 %v58_v2 }
  0x37   :  { %218 = vmatpush.msrb.mxu3 %v54_v4  ;;  %v676_v4 = vunpack.c.h.bf16 %v711_v63 }
  0x39   :  { %118 = vmatmul.f32.gmra.mxu3 %v955_v53 }
  0x3a   :  { %153 = vmatmul.f32.gmra.mxu1 %v933_v50  ;;  %194 = vmatmul.f32.gmra.mxu2 %v933_v50 }
  0x3b   :  { %219 = vmatpush.msrb.mxu3 %v50_v5 }
  0x3d   :  { %220 = vmatpush.msrb.mxu3 %v46_v6  ;;  %v712_v6 = vld [vmem:[%s1162_s0 + $0x20] sm:$0xff]  }
  0x3f   :  { %221 = vmatpush.msrb.mxu3 %v42_v9  ;;  %v716_v9 = vld [vmem:[%s1162_s0 + $0x40] sm:$0xff]  }
  0x41   :  { %121 = vmatmul.f32.gmra.mxu3 %v963_v54 }
  0x42   :  { %156 = vmatmul.f32.gmra.mxu1 %v947_v52  ;;  %197 = vmatmul.f32.gmra.mxu2 %v947_v52 }
  0x43   :  { %222 = vmatpush.msrb.mxu3 %v38_v11  ;;  %v696_v11 = vunpack.c.h.bf16 %v716_v9 }
  0x45   :  { %223 = vmatpush.msrb.mxu3 %v34_v12 }
  0x47   :  { %224 = vmatpush.msrb.mxu3 %v30_v14 }
  0x49   :  { %124 = vmatmul.f32.gmra.mxu3 %v971_v55 }
  0x4a   :  { %159 = vmatmul.f32.gmra.mxu1 %v955_v53  ;;  %200 = vmatmul.f32.gmra.mxu2 %v955_v53 }
  0x4b   :  { %225 = vmatpush.msrb.mxu3 %v26_v16 }
  0x51   :  { %226 = vmatmul.f32.vlgmr.msrb.gmra.mxu3 %v924_v49 }
  0x52   :  { %162 = vmatmul.f32.gmra.mxu1 %v963_v54  ;;  %203 = vmatmul.f32.gmra.mxu2 %v963_v54 }
  0x59   :  { %229 = vmatmul.f32.gmra.mxu3 %v938_v51 }
  0x5a   :  { %165 = vmatmul.f32.gmra.mxu1 %v971_v55  ;;  %206 = vmatmul.f32.gmra.mxu2 %v971_v55 }
  0x61   :  { %232 = vmatmul.f32.gmra.mxu3 %v919_v48 }
  0x69   :  { %235 = vmatmul.f32.gmra.mxu3 %v933_v50 }
  0x71   :  { %238 = vmatmul.f32.gmra.mxu3 %v947_v52 }
  0x79   :  { %241 = vmatmul.f32.gmra.mxu3 %v955_v53 }
  0x81   :  { %244 = vmatmul.f32.gmra.mxu3 %v963_v54 }
  0x89   :  { %247 = vmatmul.f32.gmra.mxu3 %v971_v55 }
  0x9f   :  { %v992_v60 = vpop.f32.mrf.mxu1 }
  0xa1   :  { %v104_v25 = vpop.f32.mrf.mxu0 }
  0xa4   :  { %v110_v0 = vpop.f32.mrf.mxu3 }
  0xa5   :  { %v1003_v1 = vpop.f32.mrf.mxu2 }
  0xa7   :  { %v1008_v3 = vpop.f32.mrf.mxu1 }
  0xa9   :  { %v107_v30 = vpop.f32.mrf.mxu0 }
  0xac   :  { %v113_v7 = vpop.f32.mrf.mxu3 }
  0xad   :  { %v1019_v8 = vpop.f32.mrf.mxu2 }
  0xaf   :  { %v1024_v10 = vpop.f32.mrf.mxu1 }
  0xb4   :  { %v116_v13 = vpop.f32.mrf.mxu3 }
  0xb5   :  { %v1035_v15 = vpop.f32.mrf.mxu2 }
  0xb7   :  { %v154_v17 = vpop.f32.mrf.mxu1 }
  0xbc   :  { %v119_v18 = vpop.f32.mrf.mxu3 }
  0xbd   :  { %v1041_v19 = vpop.f32.mrf.mxu2 }
  0xbf   :  { %v157_v20 = vpop.f32.mrf.mxu1 }
  0xc4   :  { %v122_v21 = vpop.f32.mrf.mxu3 }
  0xc5   :  { %v1044_v22 = vpop.f32.mrf.mxu2 }
  0xc7   :  { %v160_v23 = vpop.f32.mrf.mxu1 }
  0xcc   :  { %v125_v24 = vpop.f32.mrf.mxu3 }
  0xcd   :  { %v201_v26 = vpop.f32.mrf.mxu2  ;;  %353 = vmatpush.msrb.mxu0 %v125_v24 }
  0xcf   :  { %v163_v27 = vpop.f32.mrf.mxu1  ;;  %354 = vmatpush.msrb.mxu0 %v122_v21 }
  0xd1   :  { %355 = vmatpush.msrb.mxu0 %v119_v18 }
  0xd3   :  { %356 = vmatpush.msrb.mxu0 %v116_v13 }
  0xd4   :  { %v227_v12 = vpop.f32.mrf.mxu3 }
  0xd5   :  { %v204_v28 = vpop.f32.mrf.mxu2  ;;  %357 = vmatpush.msrb.mxu0 %v113_v7  ;;  %v679_v7 = vunpack.c.l.bf16 %v712_v6 }
  0xd7   :  { %v166_v31 = vpop.f32.mrf.mxu1  ;;  %358 = vmatpush.msrb.mxu0 %v110_v0  ;;  %v719_v0 = vld [vmem:[%s1162_s0 + $0x58] sm:$0xff]  }
  0xd8   :  { %736 = vmatpush.msrb.mxu1 %v166_v31  ;;  %v707_v2 = vunpack.c.l.bf16 %v719_v0  ;;  %v708_v5 = vunpack.c.h.bf16 %v719_v0 }
  0xd9   :  { %359 = vmatpush.msrb.mxu0 %v107_v30 }
  0xda   :  { %737 = vmatpush.msrb.mxu1 %v163_v27 }
  0xdb   :  { %360 = vmatpush.msrb.mxu0 %v104_v25 }
  0xdc   :  { %738 = vmatpush.msrb.mxu1 %v160_v23  ;;  %621 = vmatmul.msk.f32.vlgmr.msrb.gmra.mxu0 %vm320_vm0, %v663_v32  ;;  %v230_v13 = vpop.f32.mrf.mxu3 }
  0xdd   :  { %v207_v33 = vpop.f32.mrf.mxu2  ;;  %451 = vmatpush.msra.mxu0 %v166_v31 }
  0xde   :  { %739 = vmatpush.msrb.mxu1 %v157_v20  ;;  %744 = vmatpush.msrb.mxu2 %v207_v33 }
  0xdf   :  { %452 = vmatpush.msra.mxu0 %v163_v27 }
  0xe0   :  { %740 = vmatpush.msrb.mxu1 %v154_v17  ;;  %745 = vmatpush.msrb.mxu2 %v204_v28 }
  0xe1   :  { %453 = vmatpush.msra.mxu0 %v160_v23 }
  0xe2   :  { %741 = vmatpush.msrb.mxu1 %v1024_v10  ;;  %746 = vmatpush.msrb.mxu2 %v201_v26 }
  0xe3   :  { %454 = vmatpush.msra.mxu0 %v157_v20 }
  0xe4   :  { %742 = vmatpush.msrb.mxu1 %v1008_v3  ;;  %747 = vmatpush.msrb.mxu2 %v1044_v22  ;;  %v233_v16 = vpop.f32.mrf.mxu3 }
  0xe5   :  { %622 = vmatmul.msk.f32.gmra.mxu0 %vm320_vm0, %v664_v35 }
  0xe6   :  { %455 = vmatpush.msra.mxu0 %v154_v17  ;;  %743 = vmatpush.msrb.mxu1 %v992_v60 }
  0xe7   :  { %748 = vmatpush.msrb.mxu2 %v1041_v19  ;;  %639 = vmatmul.msk.f32.vlgmr.msrb.gmra.mxu1 %vm320_vm0, %v683_v36 }
  0xe8   :  { %456 = vmatpush.msra.mxu0 %v1024_v10  ;;  %v695_v10 = vunpack.c.l.bf16 %v716_v9 }
  0xe9   :  { %749 = vmatpush.msrb.mxu2 %v1035_v15 }
  0xea   :  { %457 = vmatpush.msra.mxu0 %v1008_v3  ;;  %v692_v3 = vunpack.c.h.bf16 %v715_v59 }
  0xeb   :  { %750 = vmatpush.msrb.mxu2 %v1019_v8 }
  0xec   :  { %458 = vmatpush.msra.mxu0 %v992_v60  ;;  %v672_v60 = vunpack.c.h.bf16 %v710_v46  ;;  %v236_v20 = vpop.f32.mrf.mxu3 }
  0xed   :  { %751 = vmatpush.msrb.mxu2 %v1003_v1  ;;  %623 = vmatmul.msk.f32.gmra.mxu0 %vm320_vm0, %v667_v39 }
  0xee   :  { %549 = vmatpush.msrb.mxu0 %v207_v33  ;;  %655 = vmatmul.msk.f32.vlgmr.msrb.gmra.mxu2 %vm320_vm0, %v699_v40 }
  0xef   :  { %640 = vmatmul.msk.f32.gmra.mxu1 %vm320_vm0, %v684_v41 }
  0xf0   :  { %550 = vmatpush.msrb.mxu0 %v204_v28 }
  0xf2   :  { %551 = vmatpush.msrb.mxu0 %v201_v26 }
  0xf4   :  { %552 = vmatpush.msrb.mxu0 %v1044_v22  ;;  %v239_v28 = vpop.f32.mrf.mxu3 }
  0xf5   :  { %624 = vmatmul.msk.f32.gmra.mxu0 %vm320_vm0, %v668_v43 }
  0xf6   :  { %553 = vmatpush.msrb.mxu0 %v1041_v19  ;;  %656 = vmatmul.msk.f32.gmra.mxu2 %vm320_vm0, %v700_v44 }
  0xf7   :  { %641 = vmatmul.msk.f32.gmra.mxu1 %vm320_vm0, %v687_v45 }
  0xf8   :  { %554 = vmatpush.msrb.mxu0 %v1035_v15 }
  0xfa   :  { %555 = vmatpush.msrb.mxu0 %v1019_v8  ;;  %v680_v8 = vunpack.c.h.bf16 %v712_v6 }
  0xfc   :  { %556 = vmatpush.msrb.mxu0 %v1003_v1  ;;  %v675_v1 = vunpack.c.l.bf16 %v711_v63  ;;  %v242_v38 = vpop.f32.mrf.mxu3 }
  0xfd   :  { %625 = vmatmul.msk.f32.gmra.mxu0 %vm320_vm0, %v671_v56 }
  0xfe   :  { %657 = vmatmul.msk.f32.gmra.mxu2 %vm320_vm0, %v703_v57 }
  0xff   :  { %642 = vmatmul.msk.f32.gmra.mxu1 %vm320_vm0, %v688_v58 }
 0x104   :  { %v245_v45 = vpop.f32.mrf.mxu3 }
 0x105   :  { %626 = vmatmul.msk.f32.gmra.mxu0 %vm320_vm0, %v672_v60 }
 0x106   :  { %658 = vmatmul.msk.f32.gmra.mxu2 %vm320_vm0, %v704_v61 }
 0x107   :  { %643 = vmatmul.msk.f32.gmra.mxu1 %vm320_vm0, %v691_v62 }
 0x10c   :  { %v248_v61 = vpop.f32.mrf.mxu3 }
 0x10d   :  { %627 = vmatmul.msk.f32.gmra.mxu0 %vm320_vm0, %v675_v1 }
 0x10e   :  { %659 = vmatmul.msk.f32.gmra.mxu2 %vm320_vm0, %v707_v2 }
 0x10f   :  { %644 = vmatmul.msk.f32.gmra.mxu1 %vm320_vm0, %v692_v3 }
 0x115   :  { %628 = vmatmul.msk.f32.gmra.mxu0 %vm320_vm0, %v676_v4 }
 0x116   :  { %660 = vmatmul.msk.f32.gmra.mxu2 %vm320_vm0, %v708_v5 }
 0x11d   :  { %637 = vmatmul.msk.f32.vlgmr.msra.gmra.mxu0 %vm320_vm0, %v679_v7 }
 0x125   :  { %638 = vmatmul.msk.f32.gmra.mxu0 %vm320_vm0, %v680_v8 }
 0x12d   :  { %653 = vmatmul.msk.f32.vlgmr.msrb.gmra.mxu0 %vm320_vm0, %v695_v10 }
 0x135   :  { %654 = vmatmul.msk.f32.gmra.mxu0 %vm320_vm0, %v696_v11 }
 0x159   :  { %v362_v14 = vpop.f32.mrf.mxu0 }
 0x15a   :  { %v386_v15 = vadd.f32 %v362_v14, %v227_v12 }
 0x162   :  { %v365_v17 = vpop.f32.mrf.mxu0 }
 0x163   :  { %v387_v18 = vadd.f32 %v365_v17, %v230_v13 }
 0x164   :  { %v466_v19 = vpop.f32.mrf.mxu1 }
 0x16a   :  { %v368_v21 = vpop.f32.mrf.mxu0 }
 0x16b   :  { %v388_v22 = vadd.f32 %v368_v21, %v233_v16 }
 0x16c   :  { %v469_v23 = vpop.f32.mrf.mxu1 }
 0x16d   :  { %v486_v24 = vadd.f32 %v466_v19, %v388_v22 }
 0x171   :  { %v564_v25 = vpop.f32.mrf.mxu2 }
 0x172   :  { %v584_v26 = vadd.f32 %v564_v25, %v486_v24  ;;  %v371_v27 = vpop.f32.mrf.mxu0 }
 0x173   :  { %v389_v30 = vadd.f32 %v371_v27, %v236_v20 }
 0x174   :  { %v601_v29 = vadd.f32 %v584_v26, %v919_v48  ;;  %v472_v31 = vpop.f32.mrf.mxu1 }
 0x175   :  { %v487_v32 = vadd.f32 %v469_v23, %v389_v30 }
 0x176   :  { %609 = vst [vmem:[%s1163_s3 + $0x10] sm:$0xff] %v601_v29 }
 0x179   :  { %v567_v33 = vpop.f32.mrf.mxu2 }
 0x17a   :  { %v585_v34 = vadd.f32 %v567_v33, %v487_v32  ;;  %v374_v35 = vpop.f32.mrf.mxu0 }
 0x17b   :  { %v390_v37 = vadd.f32 %v374_v35, %v239_v28 }
 0x17c   :  { %v602_v36 = vadd.f32 %v585_v34, %v933_v50  ;;  %v475_v40 = vpop.f32.mrf.mxu1 }
 0x17d   :  { %v488_v39 = vadd.f32 %v472_v31, %v390_v37 }
 0x17e   :  { %610 = vst [vmem:[%s1163_s3 + $0x18] sm:$0xff] %v602_v36 }
 0x181   :  { %v570_v48 = vpop.f32.mrf.mxu2 }
 0x182   :  { %v586_v41 = vadd.f32 %v570_v48, %v488_v39  ;;  %v377_v42 = vpop.f32.mrf.mxu0 }
 0x183   :  { %v391_v44 = vadd.f32 %v377_v42, %v242_v38 }
 0x184   :  { %v603_v43 = vadd.f32 %v586_v41, %v947_v52  ;;  %v478_v57 = vpop.f32.mrf.mxu1 }
 0x185   :  { %v489_v50 = vadd.f32 %v475_v40, %v391_v44 }
 0x186   :  { %611 = vst [vmem:[%s1163_s3 + $0x20] sm:$0xff] %v603_v43 }
 0x189   :  { %v573_v46 = vpop.f32.mrf.mxu2 }
 0x18a   :  { %v587_v47 = vadd.f32 %v573_v46, %v489_v50  ;;  %v380_v56 = vpop.f32.mrf.mxu0 }
 0x18b   :  { %v392_v59 = vadd.f32 %v380_v56, %v245_v45 }
 0x18c   :  { %v604_v58 = vadd.f32 %v587_v47, %v955_v53  ;;  %v481_v2 = vpop.f32.mrf.mxu1 }
 0x18d   :  { %v490_v60 = vadd.f32 %v478_v57, %v392_v59 }
 0x18e   :  { %612 = vst [vmem:[%s1163_s3 + $0x28] sm:$0xff] %v604_v58 }
 0x191   :  { %v576_v52 = vpop.f32.mrf.mxu2 }
 0x192   :  { %v588_v62 = vadd.f32 %v576_v52, %v490_v60  ;;  %v383_v63 = vpop.f32.mrf.mxu0 }
 0x193   :  { %v393_v1 = vadd.f32 %v383_v63, %v248_v61 }
 0x194   :  { %v605_v0 = vadd.f32 %v588_v62, %v963_v54 }
 0x195   :  { %v491_v3 = vadd.f32 %v481_v2, %v393_v1 }
 0x196   :  { %613 = vst [vmem:[%s1163_s3 + $0x30] sm:$0xff] %v605_v0 }
 0x199   :  { %v579_v53 = vpop.f32.mrf.mxu2 }
 0x19a   :  { %v589_v4 = vadd.f32 %v579_v53, %v491_v3  ;;  %v460_v5 = vpop.f32.mrf.mxu0 }
 0x19b   :  { %v484_v8 = vadd.f32 %v460_v5, %v386_v15 }
 0x19c   :  { %v606_v6 = vadd.f32 %v589_v4, %v971_v55 }
 0x19e   :  { %614 = vst [vmem:[%s1163_s3 + $0x38] sm:$0xff] %v606_v6 }
 0x1a2   :  { %v463_v7 = vpop.f32.mrf.mxu0 }
 0x1a3   :  { %v485_v11 = vadd.f32 %v463_v7, %v387_v18 }
 0x1aa   :  { %v558_v9 = vpop.f32.mrf.mxu0 }
 0x1ab   :  { %v582_v54 = vadd.f32 %v558_v9, %v484_v8 }
 0x1ad   :  { %v599_v10 = vadd.f32 %v582_v54, %v924_v49 }
 0x1af   :  { %607 = vst [vmem:[%s1163_s3] sm:$0xff] %v599_v10 }
 0x1b2   :  { %v561_v12 = vpop.f32.mrf.mxu0 }
 0x1b3   :  { %v583_v13 = vadd.f32 %v561_v12, %v485_v11 }
 0x1b5   :  { %v600_v14 = vadd.f32 %v583_v13, %v938_v51 }
 0x1b7   :  { %608 = vst [vmem:[%s1163_s3 + $0x8] sm:$0xff] %v600_v14 }

</bundles_post_ra>
